<compile_context>
chip_gen: v7x
topology: tpu7x:2x2x1
jax: 0.10.0
libtpu: 0.0.40
codegen_flags: <defaults>
</compile_context>

<pallas_src>
import math

import jax
import jax.numpy as jnp
from jax.experimental import pallas as pl
from jax.experimental.pallas import tpu as pltpu

B, S, D, H = 2, 8, 32, 4          # batch, seq, n_embed, n_head
DH = D // H                       # head dim
LN_EPS = 1e-5                     # nn.LayerNorm default eps
SCALE = 1.0 / math.sqrt(DH)


def clip_layer_kernel(x_ref, mask_ref,
                      wqkv_ref, bqkv_ref, wo_ref, bo_ref,
                      w1_ref, b1_ref, w2_ref, b2_ref,
                      o_ref):
    bf16 = jnp.bfloat16
    x = x_ref[...]                                   # (N, D) f32, N = B*S

    def layernorm(v):                                # affine folded into next matmul
        mu = jnp.mean(v, axis=-1, keepdims=True)
        var = jnp.mean((v - mu) ** 2, axis=-1, keepdims=True)
        return (v - mu) * jax.lax.rsqrt(var + LN_EPS)

    # ---- layernorm_1 (affine folded into wqkv/bqkv wrapper-side) ----
    xn = layernorm(x)

    # ---- fused QKV projection: a single (N, D) x (D, 3D) MXU dot ----
    qkv = jnp.dot(xn.astype(bf16), wqkv_ref[...],
                  preferred_element_type=jnp.float32) + bqkv_ref[...]   # (N, 3D) f32

    # Head split: static lane slices + stack -> (H, N, DH).  Cheap XLU work.
    def heads(base):
        return jnp.stack(
            [qkv[:, base + h * DH: base + (h + 1) * DH] for h in range(H)], axis=0)

    q = heads(0)           # Q columns already carry the 1/sqrt(DH) scale (folded)
    k = heads(D)
    v = heads(2 * D)

    # ---- scores + masked softmax (mask is an additive 0 / -1e30 f32 bias) ----
    s = jnp.einsum("hqe,hke->hqk", q.astype(bf16), k.astype(bf16),
                   preferred_element_type=jnp.float32)                  # (H, N, N)
    s = s + mask_ref[...]                           # broadcast over heads
    s = s - jnp.max(s, axis=-1, keepdims=True)
    p = jnp.exp(s)
    p = p * pl.reciprocal(jnp.sum(p, axis=-1, keepdims=True), approx=True)

    ctx = jnp.einsum("hqk,hke->hqe", p.astype(bf16), v.astype(bf16),
                     preferred_element_type=jnp.float32)                # (H, N, DH)

    # ---- out-projection: lane-concat of heads + ONE MXU dot (head sum in MXU) ----
    ctx2d = jnp.concatenate([ctx[h] for h in range(H)], axis=-1)        # (N, D)
    attn = jnp.dot(ctx2d.astype(bf16), wo_ref[...],
                   preferred_element_type=jnp.float32) + bo_ref[...]

    x1 = attn + x                                                       # residual 1

    # ---- layernorm_2 (affine folded into w1/b1) + MLP with QuickGELU ----
    x2 = layernorm(x1)
    hdn = jnp.dot(x2.astype(bf16), w1_ref[...],
                  preferred_element_type=jnp.float32) + b1_ref[...]
    hdn = hdn * jax.nn.sigmoid(1.702 * hdn)                             # QuickGELU, f32
    # TODO(synk): the given snippet omits linear_2, making `x += residue`
    # shape-incompatible; the 4D->D projection from the original sd/clip.py is
    # restored here so the residual add is well defined.
    out = jnp.dot(hdn.astype(bf16), w2_ref[...],
                  preferred_element_type=jnp.float32) + b2_ref[...]
    o_ref[...] = out + x1                                               # residual 2


def _prepare_params(params):
    """Fold LN affines + softmax scale into the matmul weights (wrapper-side, free)."""
    ln1w, ln1b, wqkv, bqkv, wo, bo, ln2w, ln2b, w1, b1, w2, b2 = params
    bf16 = jnp.bfloat16
    f32 = jnp.float32

    # ln1 affine folded into the fused QKV projection; 1/sqrt(DH) folded into
    # the Q columns (weight AND bias, so q' == q * SCALE exactly as reference).
    w_qkv = ln1w.reshape(D, 1) * wqkv                    # (D, 3D)
    b_qkv = ln1b @ wqkv + bqkv                           # (1, 3D)
    col_scale = jnp.concatenate(
        [jnp.full((1, D), SCALE, f32), jnp.ones((1, 2 * D), f32)], axis=1)
    w_qkv = (w_qkv * col_scale).astype(bf16)
    b_qkv = (b_qkv * col_scale).astype(f32)

    # ln2 affine folded into linear_1.
    w1f = (ln2w.reshape(D, 1) * w1).astype(bf16)
    b1f = (ln2b @ w1 + b1).astype(f32)

    return (w_qkv, b_qkv, wo.astype(bf16), bo.astype(f32),
            w1f, b1f, w2.astype(bf16), b2.astype(f32))


def _mask_bias(n):
    """Additive attention bias: causal within a sequence + block-diagonal across
    the batch elements folded into the row dim (rows are batch-major blocks of S).
    Uses a large finite negative instead of -inf (no NaN hazard)."""
    r = jax.lax.broadcasted_iota(jnp.int32, (n, n), 0)
    c = jax.lax.broadcasted_iota(jnp.int32, (n, n), 1)
    masked = (c > r) | ((r // S) != (c // S))
    return jnp.where(masked, jnp.float32(-1e30), jnp.float32(0.0))


def clip_layer(x, params):
    n = B * S                              # fold batch into the row (sublane) dim
    prepped = _prepare_params(params)
    mask = _mask_bias(n)
    x2d = x.reshape(n, D)

    def resident(a):                       # full-array block, resident in VMEM
        nd = a.ndim
        return pl.BlockSpec(a.shape, lambda i, _nd=nd: (0,) * _nd)

    grid_spec = pltpu.PrefetchScalarGridSpec(
        num_scalar_prefetch=0,
        grid=(1,),                         # single step: step overhead > compute here
        in_specs=[pl.BlockSpec((n, D), lambda i: (0, 0)), resident(mask)]
                 + [resident(a) for a in prepped],
        out_specs=pl.BlockSpec((n, D), lambda i: (0, 0)),
    )
    out2d = pl.pallas_call(
        clip_layer_kernel,
        out_shape=jax.ShapeDtypeStruct((n, D), jnp.float32),
        grid_spec=grid_spec,
        compiler_params=pltpu.CompilerParams(dimension_semantics=("arbitrary",)),
    )(x2d, mask, *prepped)
    return out2d.reshape(B, S, D)


def reference(x, params):
    """Pure-JAX f32 reference mirroring the PyTorch forward (with linear_2 restored)."""
    ln1w, ln1b, wqkv, bqkv, wo, bo, ln2w, ln2b, w1, b1, w2, b2 = params

    def ln(v, w, b):
        mu = v.mean(-1, keepdims=True)
        var = ((v - mu) ** 2).mean(-1, keepdims=True)
        return (v - mu) / jnp.sqrt(var + LN_EPS) * w + b

    xn = ln(x, ln1w, ln1b)
    qkv = xn @ wqkv + bqkv
    q, k, v = jnp.split(qkv, 3, axis=-1)
    q = q.reshape(B, S, H, DH).transpose(0, 2, 1, 3)
    k = k.reshape(B, S, H, DH).transpose(0, 2, 1, 3)
    v = v.reshape(B, S, H, DH).transpose(0, 2, 1, 3)
    s = jnp.einsum("bhqd,bhkd->bhqk", q, k)
    mask = jnp.triu(jnp.ones((S, S), bool), 1)
    s = jnp.where(mask, -jnp.inf, s) / math.sqrt(DH)
    p = jax.nn.softmax(s, axis=-1)
    o = jnp.einsum("bhqk,bhkd->bhqd", p, v).transpose(0, 2, 1, 3).reshape(B, S, D)
    o = o @ wo + bo
    x1 = o + x
    x2 = ln(x1, ln2w, ln2b)
    hdn = x2 @ w1 + b1
    hdn = hdn * jax.nn.sigmoid(1.702 * hdn)
    return hdn @ w2 + b2 + x1


if __name__ == "__main__":
    key = jax.random.PRNGKey(0)
    ks = jax.random.split(key, 10)
    sc = 0.05

    x = jax.random.normal(ks[0], (B, S, D), jnp.float32)
    ln1w = 1.0 + 0.1 * jax.random.normal(ks[1], (1, D), jnp.float32)
    ln1b = 0.1 * jax.random.normal(ks[2], (1, D), jnp.float32)
    ln2w = 1.0 + 0.1 * jax.random.normal(ks[3], (1, D), jnp.float32)
    ln2b = 0.1 * jax.random.normal(ks[4], (1, D), jnp.float32)
    wqkv = sc * jax.random.normal(ks[5], (D, 3 * D), jnp.float32)
    bqkv = sc * jax.random.normal(ks[6], (1, 3 * D), jnp.float32)
    wo = sc * jax.random.normal(ks[7], (D, D), jnp.float32)
    bo = jnp.zeros((1, D), jnp.float32)
    w1 = sc * jax.random.normal(ks[8], (D, 4 * D), jnp.float32)
    b1 = jnp.zeros((1, 4 * D), jnp.float32)
    w2 = sc * jax.random.normal(ks[9], (4 * D, D), jnp.float32)
    b2 = jnp.zeros((1, D), jnp.float32)

    params = (ln1w, ln1b, wqkv, bqkv, wo, bo, ln2w, ln2b, w1, b1, w2, b2)

    out = clip_layer(x, params)
    jax.block_until_ready(out)

    ref = reference(x, params)
    max_err = float(jnp.max(jnp.abs(out - ref)))
    assert out.shape == (B, S, D) and out.dtype == jnp.float32
    # Tolerance budget: MXU operands are bf16-rounded (rel ~2^-9), LN affines
    # are folded into bf16 weights, and the softmax denominator uses the EUP
    # approx reciprocal (~1e-3 rel); outputs are O(1).
    assert max_err < 2e-2, f"max abs err {max_err}"
    print("KERNEL_OK")
</pallas_src>

<mosaic_0001>
module attributes {stable_mosaic.version = 11 : i64} {
  func.func @clip_layer_kernel(%arg0: i32, %arg1: memref<16x32xf32, #tpu.memory_space<vmem>>, %arg2: memref<16x16xf32, #tpu.memory_space<vmem>>, %arg3: memref<32x96xbf16, #tpu.memory_space<vmem>>, %arg4: memref<1x96xf32, #tpu.memory_space<vmem>>, %arg5: memref<32x32xbf16, #tpu.memory_space<vmem>>, %arg6: memref<1x32xf32, #tpu.memory_space<vmem>>, %arg7: memref<32x128xbf16, #tpu.memory_space<vmem>>, %arg8: memref<1x128xf32, #tpu.memory_space<vmem>>, %arg9: memref<128x32xbf16, #tpu.memory_space<vmem>>, %arg10: memref<1x32xf32, #tpu.memory_space<vmem>>, %arg11: memref<16x32xf32, #tpu.memory_space<vmem>>) attributes {dimension_semantics = [#tpu.dimension_semantics<arbitrary>], iteration_bounds = array<i64: 1>, scalar_prefetch = 0 : i64, scratch_operands = 0 : i64, tpu.core_type = #tpu.core_type<tc>, window_params = [{pipeline_mode = #tpu.pipeline_mode<synchronous>, transform_indices = @transform_0, window_bounds = array<i64: 16, 32>}, {pipeline_mode = #tpu.pipeline_mode<synchronous>, transform_indices = @transform_1, window_bounds = array<i64: 16, 16>}, {pipeline_mode = #tpu.pipeline_mode<synchronous>, transform_indices = @transform_2, window_bounds = array<i64: 32, 96>}, {pipeline_mode = #tpu.pipeline_mode<synchronous>, transform_indices = @transform_3, window_bounds = array<i64: 1, 96>}, {pipeline_mode = #tpu.pipeline_mode<synchronous>, transform_indices = @transform_4, window_bounds = array<i64: 32, 32>}, {pipeline_mode = #tpu.pipeline_mode<synchronous>, transform_indices = @transform_5, window_bounds = array<i64: 1, 32>}, {pipeline_mode = #tpu.pipeline_mode<synchronous>, transform_indices = @transform_6, window_bounds = array<i64: 32, 128>}, {pipeline_mode = #tpu.pipeline_mode<synchronous>, transform_indices = @transform_7, window_bounds = array<i64: 1, 128>}, {pipeline_mode = #tpu.pipeline_mode<synchronous>, transform_indices = @transform_8, window_bounds = array<i64: 128, 32>}, {pipeline_mode = #tpu.pipeline_mode<synchronous>, transform_indices = @transform_9, window_bounds = array<i64: 1, 32>}, {pipeline_mode = #tpu.pipeline_mode<synchronous>, transform_indices = @transform_10, window_bounds = array<i64: 16, 32>}]} {
    %c0 = arith.constant 0 : index
    %c0_0 = arith.constant 0 : index
    %0 = vector.load %arg1[%c0, %c0_0] : memref<16x32xf32, #tpu.memory_space<vmem>>, vector<16x32xf32>
    %cst = arith.constant dense<0.000000e+00> : vector<16xf32>
    %1 = vector.multi_reduction <add>, %0, %cst [1] : vector<16x32xf32> to vector<16xf32>
    %2 = vector.shape_cast %1 : vector<16xf32> to vector<16x1xf32>
    %cst_1 = arith.constant 3.200000e+01 : f32
    %3 = vector.broadcast %cst_1 : f32 to vector<16x1xf32>
    %4 = arith.divf %2, %3 : vector<16x1xf32>
    %5 = vector.broadcast %4 : vector<16x1xf32> to vector<16x32xf32>
    %6 = arith.subf %0, %5 : vector<16x32xf32>
    %7 = arith.mulf %6, %6 : vector<16x32xf32>
    %cst_2 = arith.constant dense<0.000000e+00> : vector<16xf32>
    %8 = vector.multi_reduction <add>, %7, %cst_2 [1] : vector<16x32xf32> to vector<16xf32>
    %9 = vector.shape_cast %8 : vector<16xf32> to vector<16x1xf32>
    %cst_3 = arith.constant 3.200000e+01 : f32
    %10 = vector.broadcast %cst_3 : f32 to vector<16x1xf32>
    %11 = arith.divf %9, %10 : vector<16x1xf32>
    %12 = vector.broadcast %4 : vector<16x1xf32> to vector<16x32xf32>
    %13 = arith.subf %0, %12 : vector<16x32xf32>
    %cst_4 = arith.constant 9.99999974E-6 : f32
    %14 = vector.broadcast %cst_4 : f32 to vector<16x1xf32>
    %15 = arith.addf %11, %14 : vector<16x1xf32>
    %16 = math.rsqrt %15 : vector<16x1xf32>
    %17 = vector.broadcast %16 : vector<16x1xf32> to vector<16x32xf32>
    %18 = arith.mulf %13, %17 : vector<16x32xf32>
    %19 = arith.truncf %18 : vector<16x32xf32> to vector<16x32xbf16>
    %c0_5 = arith.constant 0 : index
    %c0_6 = arith.constant 0 : index
    %20 = vector.load %arg3[%c0_5, %c0_6] : memref<32x96xbf16, #tpu.memory_space<vmem>>, vector<32x96xbf16>
    %cst_7 = arith.constant dense<0.000000e+00> : vector<16x96xf32>
    %21 = tpu.matmul %19, %20, %cst_7 {dimension_numbers = #tpu.dot_dimension_numbers<[1], [0], [0], [1], [0, 0, 1, 1], [], []>} : vector<16x32xbf16>, vector<32x96xbf16>, vector<16x96xf32> -> vector<16x96xf32>
    %c0_8 = arith.constant 0 : index
    %c0_9 = arith.constant 0 : index
    %22 = vector.load %arg4[%c0_8, %c0_9] : memref<1x96xf32, #tpu.memory_space<vmem>>, vector<1x96xf32>
    %23 = vector.broadcast %22 : vector<1x96xf32> to vector<16x96xf32>
    %24 = arith.addf %21, %23 : vector<16x96xf32>
    %25 = vector.extract_strided_slice %24 {offsets = [0, 0], sizes = [16, 8], strides = [1, 1]} : vector<16x96xf32> to vector<16x8xf32>
    %26 = vector.extract_strided_slice %24 {offsets = [0, 8], sizes = [16, 8], strides = [1, 1]} : vector<16x96xf32> to vector<16x8xf32>
    %27 = vector.extract_strided_slice %24 {offsets = [0, 16], sizes = [16, 8], strides = [1, 1]} : vector<16x96xf32> to vector<16x8xf32>
    %28 = vector.extract_strided_slice %24 {offsets = [0, 24], sizes = [16, 8], strides = [1, 1]} : vector<16x96xf32> to vector<16x8xf32>
    %29 = vector.shape_cast %25 : vector<16x8xf32> to vector<1x16x8xf32>
    %30 = vector.shape_cast %26 : vector<16x8xf32> to vector<1x16x8xf32>
    %31 = vector.shape_cast %27 : vector<16x8xf32> to vector<1x16x8xf32>
    %32 = vector.shape_cast %28 : vector<16x8xf32> to vector<1x16x8xf32>
    %33 = tpu.concatenate %29, %30, %31, %32 in 0 : vector<1x16x8xf32>, vector<1x16x8xf32>, vector<1x16x8xf32>, vector<1x16x8xf32> -> vector<4x16x8xf32>
    %34 = vector.extract_strided_slice %24 {offsets = [0, 32], sizes = [16, 8], strides = [1, 1]} : vector<16x96xf32> to vector<16x8xf32>
    %35 = vector.extract_strided_slice %24 {offsets = [0, 40], sizes = [16, 8], strides = [1, 1]} : vector<16x96xf32> to vector<16x8xf32>
    %36 = vector.extract_strided_slice %24 {offsets = [0, 48], sizes = [16, 8], strides = [1, 1]} : vector<16x96xf32> to vector<16x8xf32>
    %37 = vector.extract_strided_slice %24 {offsets = [0, 56], sizes = [16, 8], strides = [1, 1]} : vector<16x96xf32> to vector<16x8xf32>
    %38 = vector.shape_cast %34 : vector<16x8xf32> to vector<1x16x8xf32>
    %39 = vector.shape_cast %35 : vector<16x8xf32> to vector<1x16x8xf32>
    %40 = vector.shape_cast %36 : vector<16x8xf32> to vector<1x16x8xf32>
    %41 = vector.shape_cast %37 : vector<16x8xf32> to vector<1x16x8xf32>
    %42 = tpu.concatenate %38, %39, %40, %41 in 0 : vector<1x16x8xf32>, vector<1x16x8xf32>, vector<1x16x8xf32>, vector<1x16x8xf32> -> vector<4x16x8xf32>
    %43 = vector.extract_strided_slice %24 {offsets = [0, 64], sizes = [16, 8], strides = [1, 1]} : vector<16x96xf32> to vector<16x8xf32>
    %44 = vector.extract_strided_slice %24 {offsets = [0, 72], sizes = [16, 8], strides = [1, 1]} : vector<16x96xf32> to vector<16x8xf32>
    %45 = vector.extract_strided_slice %24 {offsets = [0, 80], sizes = [16, 8], strides = [1, 1]} : vector<16x96xf32> to vector<16x8xf32>
    %46 = vector.extract_strided_slice %24 {offsets = [0, 88], sizes = [16, 8], strides = [1, 1]} : vector<16x96xf32> to vector<16x8xf32>
    %47 = vector.shape_cast %43 : vector<16x8xf32> to vector<1x16x8xf32>
    %48 = vector.shape_cast %44 : vector<16x8xf32> to vector<1x16x8xf32>
    %49 = vector.shape_cast %45 : vector<16x8xf32> to vector<1x16x8xf32>
    %50 = vector.shape_cast %46 : vector<16x8xf32> to vector<1x16x8xf32>
    %51 = tpu.concatenate %47, %48, %49, %50 in 0 : vector<1x16x8xf32>, vector<1x16x8xf32>, vector<1x16x8xf32>, vector<1x16x8xf32> -> vector<4x16x8xf32>
    %52 = arith.truncf %33 : vector<4x16x8xf32> to vector<4x16x8xbf16>
    %53 = arith.truncf %42 : vector<4x16x8xf32> to vector<4x16x8xbf16>
    "tpu.trace_start"() <{level = 10 : i32, message = "hqe,hke->hqk"}> : () -> ()
    %cst_10 = arith.constant dense<0.000000e+00> : vector<4x16x16xf32>
    %54 = tpu.matmul %52, %53, %cst_10 {dimension_numbers = #tpu.dot_dimension_numbers<[2], [2], [1], [1], [0, 0, 0, 1, 1, 1], [0], [0]>} : vector<4x16x8xbf16>, vector<4x16x8xbf16>, vector<4x16x16xf32> -> vector<4x16x16xf32>
    "tpu.trace_stop"() : () -> ()
    %c0_11 = arith.constant 0 : index
    %c0_12 = arith.constant 0 : index
    %55 = vector.load %arg2[%c0_11, %c0_12] : memref<16x16xf32, #tpu.memory_space<vmem>>, vector<16x16xf32>
    %56 = vector.shape_cast %55 : vector<16x16xf32> to vector<1x16x16xf32>
    %57 = vector.broadcast %56 : vector<1x16x16xf32> to vector<4x16x16xf32>
    %58 = arith.addf %54, %57 : vector<4x16x16xf32>
    %cst_13 = arith.constant dense<0xFF800000> : vector<4x16xf32>
    %59 = vector.multi_reduction <maximumf>, %58, %cst_13 [2] : vector<4x16x16xf32> to vector<4x16xf32>
    %60 = vector.shape_cast %59 : vector<4x16xf32> to vector<4x16x1xf32>
    %61 = vector.broadcast %60 : vector<4x16x1xf32> to vector<4x16x16xf32>
    %62 = arith.subf %58, %61 : vector<4x16x16xf32>
    %63 = math.exp %62 : vector<4x16x16xf32>
    %cst_14 = arith.constant dense<0.000000e+00> : vector<4x16xf32>
    %64 = vector.multi_reduction <add>, %63, %cst_14 [2] : vector<4x16x16xf32> to vector<4x16xf32>
    %65 = vector.shape_cast %64 : vector<4x16xf32> to vector<4x16x1xf32>
    %66 = tpu.reciprocal %65 {approx = true} : vector<4x16x1xf32> -> vector<4x16x1xf32>
    %67 = vector.broadcast %66 : vector<4x16x1xf32> to vector<4x16x16xf32>
    %68 = arith.mulf %63, %67 : vector<4x16x16xf32>
    %69 = arith.truncf %68 : vector<4x16x16xf32> to vector<4x16x16xbf16>
    %70 = arith.truncf %51 : vector<4x16x8xf32> to vector<4x16x8xbf16>
    "tpu.trace_start"() <{level = 10 : i32, message = "hqk,hke->hqe"}> : () -> ()
    %cst_15 = arith.constant dense<0.000000e+00> : vector<4x16x8xf32>
    %71 = tpu.matmul %69, %70, %cst_15 {dimension_numbers = #tpu.dot_dimension_numbers<[2], [1], [1], [2], [0, 0, 0, 1, 1, 2], [0], [0]>} : vector<4x16x16xbf16>, vector<4x16x8xbf16>, vector<4x16x8xf32> -> vector<4x16x8xf32>
    "tpu.trace_stop"() : () -> ()
    %72 = vector.extract_strided_slice %71 {offsets = [0, 0, 0], sizes = [1, 16, 8], strides = [1, 1, 1]} : vector<4x16x8xf32> to vector<1x16x8xf32>
    %73 = vector.shape_cast %72 : vector<1x16x8xf32> to vector<16x8xf32>
    %74 = vector.extract_strided_slice %71 {offsets = [1, 0, 0], sizes = [1, 16, 8], strides = [1, 1, 1]} : vector<4x16x8xf32> to vector<1x16x8xf32>
    %75 = vector.shape_cast %74 : vector<1x16x8xf32> to vector<16x8xf32>
    %76 = vector.extract_strided_slice %71 {offsets = [2, 0, 0], sizes = [1, 16, 8], strides = [1, 1, 1]} : vector<4x16x8xf32> to vector<1x16x8xf32>
    %77 = vector.shape_cast %76 : vector<1x16x8xf32> to vector<16x8xf32>
    %78 = vector.extract_strided_slice %71 {offsets = [3, 0, 0], sizes = [1, 16, 8], strides = [1, 1, 1]} : vector<4x16x8xf32> to vector<1x16x8xf32>
    %79 = vector.shape_cast %78 : vector<1x16x8xf32> to vector<16x8xf32>
    %80 = tpu.concatenate %73, %75, %77, %79 in 1 : vector<16x8xf32>, vector<16x8xf32>, vector<16x8xf32>, vector<16x8xf32> -> vector<16x32xf32>
    %81 = arith.truncf %80 : vector<16x32xf32> to vector<16x32xbf16>
    %c0_16 = arith.constant 0 : index
    %c0_17 = arith.constant 0 : index
    %82 = vector.load %arg5[%c0_16, %c0_17] : memref<32x32xbf16, #tpu.memory_space<vmem>>, vector<32x32xbf16>
    %cst_18 = arith.constant dense<0.000000e+00> : vector<16x32xf32>
    %83 = tpu.matmul %81, %82, %cst_18 {dimension_numbers = #tpu.dot_dimension_numbers<[1], [0], [0], [1], [0, 0, 1, 1], [], []>} : vector<16x32xbf16>, vector<32x32xbf16>, vector<16x32xf32> -> vector<16x32xf32>
    %c0_19 = arith.constant 0 : index
    %c0_20 = arith.constant 0 : index
    %84 = vector.load %arg6[%c0_19, %c0_20] : memref<1x32xf32, #tpu.memory_space<vmem>>, vector<1x32xf32>
    %85 = vector.broadcast %84 : vector<1x32xf32> to vector<16x32xf32>
    %86 = arith.addf %83, %85 : vector<16x32xf32>
    %87 = arith.addf %86, %0 : vector<16x32xf32>
    %cst_21 = arith.constant dense<0.000000e+00> : vector<16xf32>
    %88 = vector.multi_reduction <add>, %87, %cst_21 [1] : vector<16x32xf32> to vector<16xf32>
    %89 = vector.shape_cast %88 : vector<16xf32> to vector<16x1xf32>
    %cst_22 = arith.constant 3.200000e+01 : f32
    %90 = vector.broadcast %cst_22 : f32 to vector<16x1xf32>
    %91 = arith.divf %89, %90 : vector<16x1xf32>
    %92 = vector.broadcast %91 : vector<16x1xf32> to vector<16x32xf32>
    %93 = arith.subf %87, %92 : vector<16x32xf32>
    %94 = arith.mulf %93, %93 : vector<16x32xf32>
    %cst_23 = arith.constant dense<0.000000e+00> : vector<16xf32>
    %95 = vector.multi_reduction <add>, %94, %cst_23 [1] : vector<16x32xf32> to vector<16xf32>
    %96 = vector.shape_cast %95 : vector<16xf32> to vector<16x1xf32>
    %cst_24 = arith.constant 3.200000e+01 : f32
    %97 = vector.broadcast %cst_24 : f32 to vector<16x1xf32>
    %98 = arith.divf %96, %97 : vector<16x1xf32>
    %99 = vector.broadcast %91 : vector<16x1xf32> to vector<16x32xf32>
    %100 = arith.subf %87, %99 : vector<16x32xf32>
    %cst_25 = arith.constant 9.99999974E-6 : f32
    %101 = vector.broadcast %cst_25 : f32 to vector<16x1xf32>
    %102 = arith.addf %98, %101 : vector<16x1xf32>
    %103 = math.rsqrt %102 : vector<16x1xf32>
    %104 = vector.broadcast %103 : vector<16x1xf32> to vector<16x32xf32>
    %105 = arith.mulf %100, %104 : vector<16x32xf32>
    %106 = arith.truncf %105 : vector<16x32xf32> to vector<16x32xbf16>
    %c0_26 = arith.constant 0 : index
    %c0_27 = arith.constant 0 : index
    %107 = vector.load %arg7[%c0_26, %c0_27] : memref<32x128xbf16, #tpu.memory_space<vmem>>, vector<32x128xbf16>
    %cst_28 = arith.constant dense<0.000000e+00> : vector<16x128xf32>
    %108 = tpu.matmul %106, %107, %cst_28 {dimension_numbers = #tpu.dot_dimension_numbers<[1], [0], [0], [1], [0, 0, 1, 1], [], []>} : vector<16x32xbf16>, vector<32x128xbf16>, vector<16x128xf32> -> vector<16x128xf32>
    %c0_29 = arith.constant 0 : index
    %c0_30 = arith.constant 0 : index
    %109 = vector.load %arg8[%c0_29, %c0_30] : memref<1x128xf32, #tpu.memory_space<vmem>>, vector<1x128xf32>
    %110 = vector.broadcast %109 : vector<1x128xf32> to vector<16x128xf32>
    %111 = arith.addf %108, %110 : vector<16x128xf32>
    %cst_31 = arith.constant 1.702000e+00 : f32
    %112 = vector.broadcast %cst_31 : f32 to vector<16x128xf32>
    %113 = arith.mulf %112, %111 : vector<16x128xf32>
    %114 = arith.negf %113 : vector<16x128xf32>
    %115 = math.exp %114 : vector<16x128xf32>
    %cst_32 = arith.constant 1.000000e+00 : f32
    %116 = vector.broadcast %cst_32 : f32 to vector<16x128xf32>
    %117 = arith.addf %116, %115 : vector<16x128xf32>
    %118 = arith.divf %116, %117 : vector<16x128xf32>
    %119 = arith.mulf %111, %118 : vector<16x128xf32>
    %120 = arith.truncf %119 : vector<16x128xf32> to vector<16x128xbf16>
    %c0_33 = arith.constant 0 : index
    %c0_34 = arith.constant 0 : index
    %121 = vector.load %arg9[%c0_33, %c0_34] : memref<128x32xbf16, #tpu.memory_space<vmem>>, vector<128x32xbf16>
    %cst_35 = arith.constant dense<0.000000e+00> : vector<16x32xf32>
    %122 = tpu.matmul %120, %121, %cst_35 {dimension_numbers = #tpu.dot_dimension_numbers<[1], [0], [0], [1], [0, 0, 1, 1], [], []>} : vector<16x128xbf16>, vector<128x32xbf16>, vector<16x32xf32> -> vector<16x32xf32>
    %c0_36 = arith.constant 0 : index
    %c0_37 = arith.constant 0 : index
    %123 = vector.load %arg10[%c0_36, %c0_37] : memref<1x32xf32, #tpu.memory_space<vmem>>, vector<1x32xf32>
    %124 = vector.broadcast %123 : vector<1x32xf32> to vector<16x32xf32>
    %125 = arith.addf %122, %124 : vector<16x32xf32>
    %126 = arith.addf %125, %87 : vector<16x32xf32>
    %c0_38 = arith.constant 0 : index
    %c0_39 = arith.constant 0 : index
    %127 = vector.load %arg11[%c0_38, %c0_39] : memref<16x32xf32, #tpu.memory_space<vmem>>, vector<16x32xf32>
    tpu.vector_store %arg11[%c0_38, %c0_39], %126 {strides = array<i32>} : memref<16x32xf32, #tpu.memory_space<vmem>>, vector<16x32xf32>,
    return
  }
  func.func @transform_0(%arg0: i32) -> (i32, i32) {
    %c0_i32 = arith.constant 0 : i32
    %c0_i32_0 = arith.constant 0 : i32
    %c0_i32_1 = arith.constant 0 : i32
    return %c0_i32, %c0_i32_0 : i32, i32
  }
  func.func @transform_1(%arg0: i32) -> (i32, i32) {
    %c0_i32 = arith.constant 0 : i32
    %c0_i32_0 = arith.constant 0 : i32
    %c0_i32_1 = arith.constant 0 : i32
    return %c0_i32, %c0_i32_0 : i32, i32
  }
  func.func @transform_2(%arg0: i32) -> (i32, i32) {
    %c0_i32 = arith.constant 0 : i32
    %c0_i32_0 = arith.constant 0 : i32
    %c0_i32_1 = arith.constant 0 : i32
    return %c0_i32, %c0_i32_0 : i32, i32
  }
  func.func @transform_3(%arg0: i32) -> (i32, i32) {
    %c0_i32 = arith.constant 0 : i32
    %c0_i32_0 = arith.constant 0 : i32
    %c0_i32_1 = arith.constant 0 : i32
    return %c0_i32, %c0_i32_0 : i32, i32
  }
  func.func @transform_4(%arg0: i32) -> (i32, i32) {
    %c0_i32 = arith.constant 0 : i32
    %c0_i32_0 = arith.constant 0 : i32
    %c0_i32_1 = arith.constant 0 : i32
    return %c0_i32, %c0_i32_0 : i32, i32
  }
  func.func @transform_5(%arg0: i32) -> (i32, i32) {
    %c0_i32 = arith.constant 0 : i32
    %c0_i32_0 = arith.constant 0 : i32
    %c0_i32_1 = arith.constant 0 : i32
    return %c0_i32, %c0_i32_0 : i32, i32
  }
  func.func @transform_6(%arg0: i32) -> (i32, i32) {
    %c0_i32 = arith.constant 0 : i32
    %c0_i32_0 = arith.constant 0 : i32
    %c0_i32_1 = arith.constant 0 : i32
    return %c0_i32, %c0_i32_0 : i32, i32
  }
  func.func @transform_7(%arg0: i32) -> (i32, i32) {
    %c0_i32 = arith.constant 0 : i32
    %c0_i32_0 = arith.constant 0 : i32
    %c0_i32_1 = arith.constant 0 : i32
    return %c0_i32, %c0_i32_0 : i32, i32
  }
  func.func @transform_8(%arg0: i32) -> (i32, i32) {
    %c0_i32 = arith.constant 0 : i32
    %c0_i32_0 = arith.constant 0 : i32
    %c0_i32_1 = arith.constant 0 : i32
    return %c0_i32, %c0_i32_0 : i32, i32
  }
  func.func @transform_9(%arg0: i32) -> (i32, i32) {
    %c0_i32 = arith.constant 0 : i32
    %c0_i32_0 = arith.constant 0 : i32
    %c0_i32_1 = arith.constant 0 : i32
    return %c0_i32, %c0_i32_0 : i32, i32
  }
  func.func @transform_10(%arg0: i32) -> (i32, i32) {
    %c0_i32 = arith.constant 0 : i32
    %c0_i32_0 = arith.constant 0 : i32
    %c0_i32_1 = arith.constant 0 : i32
    return %c0_i32, %c0_i32_0 : i32, i32
  }
}

</mosaic_0001>

<bundles_post_ra>
// kernel: tpu_custom_call.1
= control target key start
LH: loop header
LB: loop body
LE: loop exit
PB: predicated region body
PF: predicated region fallthrough
CT: control target
= control target key end

     0   :  { %vm39_vm0 = vcmask 261120   ;;  %s1554_s0 = inlined_call_operand.vmem [shape: f32[16,32], index: 0, kind: input, shape index: {}]   ;;  %s1555_s1 = inlined_call_operand.vmem [shape: f32[16,16], index: 1, kind: input, shape index: {}]   ;;  %s1556_s2 = inlined_call_operand.vmem [shape: bf16[32,96], index: 2, kind: input, shape index: {}]   ;;  %s1557_s3 = inlined_call_operand.vmem [shape: f32[1,96], index: 3, kind: input, shape index: {}]   ;;  %s1558_s4 = inlined_call_operand.vmem [shape: bf16[32,32], index: 4, kind: input, shape index: {}]   ;;  %s1559_s5 = inlined_call_operand.vmem [shape: f32[1,32], index: 5, kind: input, shape index: {}]   ;;  %s1560_s6 = inlined_call_operand.vmem [shape: bf16[32,128], index: 6, kind: input, shape index: {}]   ;;  %s1561_s7 = inlined_call_operand.vmem [shape: f32[1,128], index: 7, kind: input, shape index: {}]   ;;  %s1562_s8 = inlined_call_operand.vmem [shape: bf16[128,32], index: 8, kind: input, shape index: {}]   ;;  %s1563_s9 = inlined_call_operand.vmem [shape: f32[1,32], index: 9, kind: input, shape index: {}]   ;;  %s1564_s10 = inlined_call_operand.hbm [shape: f32[16,32], index: 10, kind: output, shape index: {}]  }
   0x1   :  { %v1342_v0 = vld [vmem:[%s1554_s0] sm:$0xff]  ;;  %v1347_v1 = vld [vmem:[%s1554_s0 + $0x8] sm:$0xff] }
   0x2   :  { %v40_v2 = vsel %vm39_vm0, %v1342_v0, 0.0  ;;  %v43_v3 = vsel %vm39_vm0, %v1347_v1, 0.0 }
   0x3   :  { %41 = vadd.xlane.f32.xlu0 %v40_v2 }
   0x7   :  { %44 = vadd.xlane.f32.xlu0 %v43_v3 }
   0x8   :  { %15 = vsyncpa [#allocation3], 0  ;;  %v1186_v14 = vld [vmem:[%s1556_s2] sm:$0xff]   ;;  %v1272_v15 = vmov 0.0   ;;  %vm1273_vm1 = vmmov 0   ;;  %v1187_v16 = vld [vmem:[%s1556_s2 + $0x8] sm:$0xff]  }
   0x9   :  { %1052 = vmatprep.subr.bf16.mxu0 %v1272_v15  ;;  %1056 = vmatprep.mubr.msk.bf16.mxu0 %vm1273_vm1, %v1272_v15  ;;  %v987_v28 = vld [vmem:[%s1557_s3] ss:$0 sm:$0xff]  ;;  %s1274_s21 = smov 112   ;;  %s1275_s22 = smov 120   ;;  %vm164_vm2 = vcmask 64512   ;;  %v160_v59 = vld [vmem:[%s1555_s1 + $0x8] sm:$0xff] }
   0xa   :  { %1053 = vmatpush3.bf16.msra.mxu0 %v1186_v14  ;;  %1072 = vmatprep.subr.bf16.mxu1 %v1272_v15  ;;  %s1276_s23 = smov 104   ;;  %s1277_s24 = smov 96   ;;  %v159_v57 = vld [vmem:[%s1555_s1] sm:$0xff]  ;;  %vm362_vm3 = vcmask 130048   ;;  %vm671_vm4 = vcmask 195584  }
   0xb   :  { %1054 = vmatprep.subr.bf16.mxu0 %v1272_v15  ;;  %1074 = vmatprep.mubr.msk.bf16.mxu1 %vm1273_vm1, %v1272_v15  ;;  %s1278_s1 = smov 64   ;;  %s1279_s12 = smov 8  }
   0xc   :  { %s1280_s13 = smov 16  }
   0xe   :  { %1055 = vmatpush3.bf16.msra.mxu0 %v1187_v16 }
   0xf   :  { %1060 = vmatprep.subr.bf16.mxu0 %v1272_v15 }
  0x90   :  { %v42_v4 = vpop.xlane.xlu0 %41 }
  0x91   :  { %v47_v5 = vmul.f32 0.03125, %v42_v4 }
  0x93   :  { %v49_v6 = vsub.f32 %v1342_v0, %v47_v5 }
  0x94   :  { %v45_v7 = vpop.xlane.xlu0 %44 }
  0x95   :  { %v48_v8 = vmul.f32 0.03125, %v45_v7  ;;  %v51_v9 = vmul.f32 %v49_v6, %v49_v6 }
  0x97   :  { %v50_v10 = vsub.f32 %v1347_v1, %v48_v8  ;;  %v53_v11 = vsel %vm39_vm0, %v51_v9, 0.0 }
  0x98   :  { %54 = vadd.xlane.f32.xlu1 %v53_v11 }
  0x99   :  { %v52_v12 = vmul.f32 %v50_v10, %v50_v10 }
  0x9b   :  { %v56_v13 = vsel %vm39_vm0, %v52_v12, 0.0 }
  0x9c   :  { %57 = vadd.xlane.f32.xlu1 %v56_v13 }
 0x125   :  { %v55_v17 = vpop.xlane.xlu1 %54 }
 0x126   :  { %v59_v18 = vmul.f32 0.03125, %v55_v17 }
 0x128   :  { %v61_v19 = vadd.f32 1e-05, %v59_v18 }
 0x129   :  { %v58_v20 = vpop.xlane.xlu1 %57 }
 0x12a   :  { %v60_v21 = vmul.f32 0.03125, %v58_v20  ;;  %1200 = vrsqrt.f32 %v61_v19 }
 0x12c   :  { %v62_v22 = vadd.f32 1e-05, %v60_v21 }
 0x12e   :  { %1202 = vrsqrt.f32 %v62_v22 }
 0x134   :  { %v1201_v23 = vpop.eup %1200 }
 0x135   :  { %v65_v25 = vmul.f32 %v1201_v23, %v49_v6 }
 0x138   :  { %v1203_v24 = vpop.eup %1202 }
 0x139   :  { %v66_v26 = vmul.f32 %v1203_v24, %v50_v10 }
 0x13b   :  { %v67_v27 = vpack.c.bf16 %v66_v26, %v65_v25 }
 0x13d   :  { %1057 = vmatmul.mubr.msk.bf16.vlgmr.msra.gmra.mrb[0].mxu0 %vm39_vm0, %v67_v27 }
 0x13e   :  { %1062 = vmatprep.mubr.msk.bf16.mxu0 %vm1273_vm1, %v1272_v15 }
 0x210   :  { %v128_v29 = vpop.f32.mrb[0].mxu0 }
 0x211   :  { %v1058_v30 = vpop.f32.mrb[1].mxu0  ;;  %v129_v32 = vadd.f32 %v987_v28, %v128_v29 }
 0x212   :  { %v131_v31 = vpop.f32.mrb[2].mxu0 }
 0x213   :  { %v132_v33 = vadd.f32 %v987_v28, %v131_v31  ;;  %v1059_v34 = vpop.f32.mrb[3].mxu0 }
 0x215   :  { %v1161_v35 = vpack.i.bf16 %v132_v33, %v129_v32  ;;  %v1377_v36 = vpack.c.bf16 %v132_v33, %v129_v32 }
 0x217   :  { %1162 = vrot.lane.b32.xlu1 %v1161_v35, %s1274_s21  ;;  %1157 = vrot.lane.b32.xlu0 %v1161_v35, %s1275_s22 }
 0x21b   :  { %1167 = vrot.lane.b32.xlu1 %v1161_v35, %s1276_s23 }
 0x21f   :  { %162 = vrot.lane.b32.xlu1 %v1377_v36, %s1277_s24 }
 0x289   :  { %v1163_v37 = vpop.permute.xlu1 %1162  ;;  %v1158_v38 = vpop.permute.xlu0 %1157 }
 0x28a   :  { %v1165_v39 = vunpack.i.h.bf16 %v1163_v37  ;;  %v1164_v40 = vunpack.i.l.bf16 %v1163_v37  ;;  %v1160_v41 = vunpack.i.h.bf16 %v1158_v38  ;;  %v1159_v42 = vunpack.i.l.bf16 %v1158_v38 }
 0x28c   :  { %v1380_v43 = vpack.c.bf16 %v1165_v39, %v1164_v40  ;;  %v1382_v44 = vpack.c.bf16 %v1160_v41, %v1159_v42 }
 0x28d   :  { %v1168_v45 = vpop.permute.xlu1 %1167 }
 0x28e   :  { %v1170_v46 = vunpack.i.h.bf16 %v1168_v45  ;;  %v1169_v47 = vunpack.i.l.bf16 %v1168_v45  ;;  %213 = vrot.lane.b32.xlu0 %v1382_v44, %s1277_s24  ;;  %263 = vrot.lane.b32.xlu1 %v1380_v43, %s1277_s24 }
 0x290   :  { %v1386_v48 = vpack.c.bf16 %v1170_v46, %v1169_v47 }
 0x291   :  { %v163_v49 = vpop.permute.xlu1 %162 }
 0x292   :  { %v169_v50 = vsel %vm164_vm2, %v163_v49, 0  ;;  %313 = vrot.lane.b32.xlu0 %v1386_v48, %s1277_s24 }
 0x293   :  { %1061 = vmatpush3.bf16.xpose.msra.mxu0 %v169_v50 }
 0x294   :  { %1066 = vmatprep.subr.bf16.mxu0 %v1272_v15 }
 0x29a   :  { %1063 = vmatmul.mubr.msk.bf16.vlgmr.msra.gmra.mrb[4].mxu0 %vm164_vm2, %v1377_v36 }
 0x29b   :  { %1068 = vmatprep.mubr.msk.bf16.mxu0 %vm1273_vm1, %v1272_v15 }
 0x300   :  { %v214_v51 = vpop.permute.xlu0 %213  ;;  %v264_v52 = vpop.permute.xlu1 %263 }
 0x301   :  { %v219_v53 = vsel %vm164_vm2, %v214_v51, 0  ;;  %v269_v54 = vsel %vm164_vm2, %v264_v52, 0 }
 0x302   :  { %1067 = vmatpush3.bf16.xpose.msra.mxu0 %v219_v53  ;;  %1073 = vmatpush3.bf16.xpose.msra.mxu1 %v269_v54 }
 0x303   :  { %1078 = vmatprep.subr.bf16.mxu0 %v1272_v15  ;;  %1084 = vmatprep.subr.bf16.mxu1 %v1272_v15 }
 0x304   :  { %v314_v55 = vpop.permute.xlu0 %313 }
 0x305   :  { %v319_v56 = vsel %vm164_vm2, %v314_v55, 0 }
 0x309   :  { %1069 = vmatmul.mubr.msk.bf16.vlgmr.msra.gmra.mrb[8].mxu0 %vm164_vm2, %v1382_v44  ;;  %1075 = vmatmul.mubr.msk.bf16.vlgmr.msra.gmra.mrb[0].mxu1 %vm164_vm2, %v1380_v43 }
 0x30a   :  { %1079 = vmatpush3.bf16.xpose.msra.mxu0 %v319_v56  ;;  %1080 = vmatprep.mubr.msk.bf16.mxu0 %vm1273_vm1, %v1272_v15 }
 0x30b   :  { %1086 = vmatprep.mubr.msk.bf16.mxu1 %vm1273_vm1, %v1272_v15  ;;  %1090 = vmatprep.subr.bf16.mxu0 %v1272_v15 }
 0x311   :  { %1081 = vmatmul.mubr.msk.bf16.vlgmr.msra.gmra.mrb[12].mxu0 %vm164_vm2, %v1386_v48 }
 0x312   :  { %1092 = vmatprep.mubr.msk.bf16.mxu0 %vm1273_vm1, %v1272_v15 }
 0x36d   :  { %v205_v58 = vpop.f32.mrb[4].mxu0 }
 0x36e   :  { %v206_v60 = vadd.f32 %v205_v58, %v159_v57  ;;  %v1064_v61 = vpop.f32.mrb[5].mxu0 }
 0x36f   :  { %v208_v62 = vpop.f32.mrb[6].mxu0 }
 0x370   :  { %v209_v63 = vadd.f32 %v208_v62, %v160_v59  ;;  %v1065_v2 = vpop.f32.mrb[7].mxu0  ;;  %v363_v3 = vsel %vm362_vm3, %v206_v60, -inf }
 0x371   :  { %364 = vmax.xlane.f32.xlu1 %v363_v3 }
 0x372   :  { %v366_v4 = vsel %vm362_vm3, %v209_v63, -inf }
 0x373   :  { %367 = vmax.xlane.f32.xlu0 %v366_v4 }
 0x3dc   :  { %v255_v5 = vpop.f32.mrb[8].mxu0  ;;  %v305_v6 = vpop.f32.mrb[0].mxu1 }
 0x3dd   :  { %v256_v7 = vadd.f32 %v255_v5, %v159_v57  ;;  %v306_v8 = vadd.f32 %v305_v6, %v159_v57  ;;  %v1070_v9 = vpop.f32.mrb[9].mxu0  ;;  %v1076_v10 = vpop.f32.mrb[1].mxu1 }
 0x3de   :  { %v258_v11 = vpop.f32.mrb[10].mxu0  ;;  %v308_v12 = vpop.f32.mrb[2].mxu1 }
 0x3df   :  { %v259_v13 = vadd.f32 %v258_v11, %v160_v59  ;;  %v1071_v14 = vpop.f32.mrb[11].mxu0  ;;  %v1077_v16 = vpop.f32.mrb[3].mxu1  ;;  %v375_v17 = vsel %vm362_vm3, %v306_v8, -inf  ;;  %v369_v18 = vsel %vm362_vm3, %v256_v7, -inf  ;;  %v309_v19 = vadd.f32 %v308_v12, %v160_v59 }
 0x3e0   :  { %376 = vmax.xlane.f32.xlu1 %v375_v17  ;;  %370 = vmax.xlane.f32.xlu0 %v369_v18 }
 0x3e1   :  { %v372_v20 = vsel %vm362_vm3, %v259_v13, -inf  ;;  %v378_v27 = vsel %vm362_vm3, %v309_v19, -inf }
 0x3e4   :  { %373 = vmax.xlane.f32.xlu0 %v372_v20  ;;  %v355_v21 = vpop.f32.mrb[12].mxu0 }
 0x3e5   :  { %v356_v22 = vadd.f32 %v355_v21, %v159_v57  ;;  %v1082_v23 = vpop.f32.mrb[13].mxu0 }
 0x3e6   :  { %v358_v24 = vpop.f32.mrb[14].mxu0 }
 0x3e7   :  { %v359_v25 = vadd.f32 %v358_v24, %v160_v59  ;;  %v1083_v26 = vpop.f32.mrb[15].mxu0  ;;  %v381_v28 = vsel %vm362_vm3, %v356_v22, -inf }
 0x3e8   :  { %379 = vmax.xlane.f32.xlu0 %v378_v27  ;;  %382 = vmax.xlane.f32.xlu1 %v381_v28 }
 0x3e9   :  { %v384_v29 = vsel %vm362_vm3, %v359_v25, -inf }
 0x3ec   :  { %385 = vmax.xlane.f32.xlu0 %v384_v29 }
 0x3f9   :  { %455 = vrot.lane.b32.xlu1 %v1377_v36, %s1278_s1 }
 0x3fe   :  { %v365_v33 = vpop.xlane.xlu1 %364 }
 0x3ff   :  { %v387_v34 = vsub.f32 %v206_v60, %v365_v33 }
 0x400   :  { %v368_v30 = vpop.xlane.xlu0 %367 }
 0x401   :  { %v388_v31 = vsub.f32 %v209_v63, %v368_v30  ;;  %v395_v35 = vmul.f32 1.442695, %v387_v34 }
 0x403   :  { %v397_v32 = vmul.f32 1.442695, %v388_v31 }
 0x405   :  { %1204 = vpow2.f32 %v397_v32 }
 0x406   :  { %1206 = vpow2.f32 %v395_v35 }
 0x40f   :  { %v1205_v37 = vpop.eup %1204 }
 0x410   :  { %v414_v38 = vsel %vm362_vm3, %v1205_v37, 0.0  ;;  %v1207_v39 = vpop.eup %1206 }
 0x411   :  { %415 = vadd.xlane.f32.xlu0 %v414_v38  ;;  %v411_v40 = vsel %vm362_vm3, %v1207_v39, 0.0 }
 0x41d   :  { %412 = vadd.xlane.f32.xlu1 %v411_v40 }
 0x46d   :  { %v377_v41 = vpop.xlane.xlu1 %376  ;;  %v371_v42 = vpop.xlane.xlu0 %370 }
 0x46e   :  { %v391_v45 = vsub.f32 %v306_v8, %v377_v41  ;;  %v389_v36 = vsub.f32 %v256_v7, %v371_v42 }
 0x470   :  { %v399_v46 = vmul.f32 1.442695, %v389_v36  ;;  %v403_v47 = vmul.f32 1.442695, %v391_v45 }
 0x471   :  { %v374_v49 = vpop.xlane.xlu0 %373 }
 0x472   :  { %v390_v50 = vsub.f32 %v259_v13, %v374_v49  ;;  %1208 = vpow2.f32 %v399_v46 }
 0x473   :  { %1210 = vpow2.f32 %v403_v47  ;;  %v1188_v47 = vld [vmem:[%s1558_s4] sm:$0xff]  }
 0x474   :  { %v401_v51 = vmul.f32 1.442695, %v390_v50 }
 0x475   :  { %v380_v52 = vpop.xlane.xlu0 %379  ;;  %v383_v53 = vpop.xlane.xlu1 %382 }
 0x476   :  { %1212 = vpow2.f32 %v401_v51  ;;  %v392_v54 = vsub.f32 %v309_v19, %v380_v52  ;;  %v393_v55 = vsub.f32 %v356_v22, %v383_v53  ;;  %v1189_v51 = vld [vmem:[%s1558_s4 + $0x8] sm:$0xff]   ;;  %s1281_s4 = smov 24  }
 0x478   :  { %v405_v56 = vmul.f32 1.442695, %v392_v54  ;;  %v407_v57 = vmul.f32 1.442695, %v393_v55 }
 0x479   :  { %v456_v58 = vpop.permute.xlu1 %455  ;;  %v386_v59 = vpop.xlane.xlu0 %385 }
 0x47a   :  { %1214 = vpow2.f32 %v405_v56  ;;  %v394_v60 = vsub.f32 %v359_v25, %v386_v59  ;;  %1085 = vmatpush3.bf16.msra.mxu1 %v456_v58 }
 0x47b   :  { %1216 = vpow2.f32 %v407_v57  ;;  %1096 = vmatprep.subr.bf16.mxu1 %v1272_v15 }
 0x47c   :  { %v409_v61 = vmul.f32 1.442695, %v394_v60  ;;  %v1209_v62 = vpop.eup %1208 }
 0x47d   :  { %v417_v63 = vsel %vm362_vm3, %v1209_v62, 0.0  ;;  %v1211_v2 = vpop.eup %1210 }
 0x47e   :  { %1218 = vpow2.f32 %v409_v61  ;;  %418 = vadd.xlane.f32.xlu1 %v417_v63  ;;  %v423_v5 = vsel %vm362_vm3, %v1211_v2, 0.0 }
 0x480   :  { %v1213_v3 = vpop.eup %1212 }
 0x481   :  { %v420_v4 = vsel %vm362_vm3, %v1213_v3, 0.0 }
 0x482   :  { %421 = vadd.xlane.f32.xlu0 %v420_v4  ;;  %424 = vadd.xlane.f32.xlu1 %v423_v5 }
 0x484   :  { %v1215_v6 = vpop.eup %1214 }
 0x485   :  { %v1217_v7 = vpop.eup %1216  ;;  %v426_v8 = vsel %vm362_vm3, %v1215_v6, 0.0 }
 0x486   :  { %v429_v9 = vsel %vm362_vm3, %v1217_v7, 0.0  ;;  %427 = vadd.xlane.f32.xlu0 %v426_v8 }
 0x487   :  { %430 = vadd.xlane.f32.xlu1 %v429_v9 }
 0x488   :  { %v1219_v10 = vpop.eup %1218 }
 0x489   :  { %v432_v11 = vsel %vm362_vm3, %v1219_v10, 0.0 }
 0x48a   :  { %433 = vadd.xlane.f32.xlu0 %v432_v11 }
 0x498   :  { %549 = vrot.lane.b32.xlu1 %v1380_v43, %s1278_s1 }
 0x49c   :  { %596 = vrot.lane.b32.xlu1 %v1386_v48, %s1278_s1 }
 0x49e   :  { %v416_v12 = vpop.xlane.xlu0 %415 }
 0x49f   :  { %1220 = vrcp.f32 %v416_v12 }
 0x4a0   :  { %502 = vrot.lane.b32.xlu0 %v1382_v44, %s1278_s1 }
 0x4a9   :  { %v1221_v14 = vpop.eup %1220 }
 0x4aa   :  { %v413_v13 = vpop.xlane.xlu1 %412  ;;  %v444_v17 = vmul.f32 %v1221_v14, %v1205_v37 }
 0x4ab   :  { %1222 = vrcp.f32 %v413_v13 }
 0x4b5   :  { %v1223_v16 = vpop.eup %1222 }
 0x4b6   :  { %v443_v18 = vmul.f32 %v1223_v16, %v1207_v39 }
 0x4b8   :  { %v451_v19 = vpack.c.bf16 %v444_v17, %v443_v18 }
 0x4ba   :  { %1087 = vmatmul.mubr.msk.bf16.vlgmr.msra.gmra.mrb[4].mxu1 %vm362_vm3, %v451_v19 }
 0x4bb   :  { %1098 = vmatprep.mubr.msk.bf16.mxu1 %vm1273_vm1, %v1272_v15 }
 0x50b   :  { %v419_v43 = vpop.xlane.xlu1 %418 }
 0x50c   :  { %1224 = vrcp.f32 %v419_v43  ;;  %v999_v43 = vld [vmem:[%s1559_s5] ss:$0 sm:$0xff] }
 0x50f   :  { %v422_v48 = vpop.xlane.xlu0 %421  ;;  %v425_v20 = vpop.xlane.xlu1 %424 }
 0x510   :  { %1226 = vrcp.f32 %v422_v48 }
 0x511   :  { %1228 = vrcp.f32 %v425_v20 }
 0x513   :  { %v428_v44 = vpop.xlane.xlu0 %427 }
 0x514   :  { %v431_v21 = vpop.xlane.xlu1 %430  ;;  %1230 = vrcp.f32 %v428_v44 }
 0x515   :  { %1232 = vrcp.f32 %v431_v21 }
 0x516   :  { %v1225_v23 = vpop.eup %1224 }
 0x517   :  { %v434_v22 = vpop.xlane.xlu0 %433  ;;  %v445_v26 = vmul.f32 %v1225_v23, %v1209_v62 }
 0x518   :  { %v550_v24 = vpop.permute.xlu1 %549  ;;  %1234 = vrcp.f32 %v434_v22 }
 0x519   :  { %1097 = vmatpush3.bf16.msra.mxu1 %v550_v24 }
 0x51a   :  { %v1227_v25 = vpop.eup %1226  ;;  %1108 = vmatprep.subr.bf16.mxu1 %v1272_v15 }
 0x51b   :  { %v446_v27 = vmul.f32 %v1227_v25, %v1213_v3  ;;  %v503_v28 = vpop.permute.xlu0 %502  ;;  %v1229_v29 = vpop.eup %1228 }
 0x51c   :  { %1091 = vmatpush3.bf16.msra.mxu0 %v503_v28  ;;  %v447_v32 = vmul.f32 %v1229_v29, %v1211_v2  ;;  %v597_v34 = vpop.permute.xlu1 %596 }
 0x51d   :  { %v452_v30 = vpack.c.bf16 %v446_v27, %v445_v26  ;;  %1102 = vmatprep.subr.bf16.mxu0 %v1272_v15 }
 0x51e   :  { %v1231_v31 = vpop.eup %1230 }
 0x51f   :  { %v448_v33 = vmul.f32 %v1231_v31, %v1215_v6  ;;  %1093 = vmatmul.mubr.msk.bf16.vlgmr.msra.gmra.mrb[16].mxu0 %vm362_vm3, %v452_v30  ;;  %v1233_v35 = vpop.eup %1232 }
 0x520   :  { %1103 = vmatpush3.bf16.msra.mxu0 %v597_v34  ;;  %1104 = vmatprep.mubr.msk.bf16.mxu0 %vm1273_vm1, %v1272_v15  ;;  %v449_v39 = vmul.f32 %v1233_v35, %v1217_v7 }
 0x521   :  { %v453_v37 = vpack.c.bf16 %v448_v33, %v447_v32  ;;  %1116 = vmatprep.subr.bf16.mxu0 %v1272_v15 }
 0x522   :  { %v1235_v38 = vpop.eup %1234 }
 0x523   :  { %v450_v40 = vmul.f32 %v1235_v38, %v1219_v10  ;;  %1099 = vmatmul.mubr.msk.bf16.vlgmr.msra.gmra.mrb[8].mxu1 %vm362_vm3, %v453_v37  ;;  %v1190_v37 = vld [vmem:[%s1560_s6] sm:$0xff]   ;;  %v1191_v38 = vld [vmem:[%s1560_s6 + $0x8] sm:$0xff]  }
 0x524   :  { %1112 = vmatprep.mubr.msk.bf16.mxu1 %vm1273_vm1, %v1272_v15  ;;  %1109 = vmatpush3.bf16.msra.mxu1 %v1188_v47 }
 0x525   :  { %v454_v41 = vpack.c.bf16 %v450_v40, %v449_v39  ;;  %1110 = vmatprep.subr.bf16.mxu1 %v1272_v15 }
 0x527   :  { %1105 = vmatmul.mubr.msk.bf16.vlgmr.msra.gmra.mrb[20].mxu0 %vm362_vm3, %v454_v41 }
 0x528   :  { %1120 = vmatprep.mubr.msk.bf16.mxu0 %vm1273_vm1, %v1272_v15  ;;  %1111 = vmatpush3.bf16.msra.mxu1 %v1189_v51 }
 0x529   :  { %1124 = vmatprep.subr.bf16.mxu1 %v1272_v15  ;;  %1117 = vmatpush3.bf16.msra.mxu0 %v1190_v37 }
 0x52a   :  { %1118 = vmatprep.subr.bf16.mxu0 %v1272_v15 }
 0x52d   :  { %1119 = vmatpush3.bf16.msra.mxu0 %v1191_v38 }
 0x58d   :  { %v495_v42 = vpop.f32.mrb[4].mxu1 }
 0x58e   :  { %v1088_v45 = vpop.f32.mrb[5].mxu1 }
 0x58f   :  { %v498_v36 = vpop.f32.mrb[6].mxu1 }
 0x590   :  { %v1089_v46 = vpop.f32.mrb[7].mxu1 }
 0x5f2   :  { %v542_v49 = vpop.f32.mrb[16].mxu0 }
 0x5f3   :  { %v1094_v50 = vpop.f32.mrb[17].mxu0 }
 0x5f4   :  { %v545_v52 = vpop.f32.mrb[18].mxu0 }
 0x5f5   :  { %v1171_v53 = vpack.i.bf16 %v545_v52, %v542_v49  ;;  %v1095_v54 = vpop.f32.mrb[19].mxu0  ;;  %v1192_v52 = vld [vmem:[%s1562_s8] sm:$0xff]  }
 0x5f6   :  { %v589_v55 = vpop.f32.mrb[8].mxu1  ;;  %v1194_v54 = vld [vmem:[%s1562_s8 + $0x10] sm:$0xff]  }
 0x5f7   :  { %v1100_v56 = vpop.f32.mrb[9].mxu1  ;;  %1172 = vrot.lane.b32.xlu1 %v1171_v53, %s1279_s12  ;;  %v1193_v53 = vld [vmem:[%s1562_s8 + $0x8] sm:$0xff]  }
 0x5f8   :  { %v592_v57 = vpop.f32.mrb[10].mxu1  ;;  %v1196_v56 = vld [vmem:[%s1562_s8 + $0x20] sm:$0xff]  }
 0x5f9   :  { %v1176_v58 = vpack.i.bf16 %v592_v57, %v589_v55  ;;  %v1101_v59 = vpop.f32.mrb[11].mxu1  ;;  %v1195_v55 = vld [vmem:[%s1562_s8 + $0x18] sm:$0xff]   ;;  %v1197_v57 = vld [vmem:[%s1562_s8 + $0x28] sm:$0xff]  }
 0x5fa   :  { %v636_v60 = vpop.f32.mrb[20].mxu0  ;;  %v1199_v59 = vld [vmem:[%s1562_s8 + $0x38] sm:$0xff]  }
 0x5fb   :  { %1177 = vrot.lane.b32.xlu0 %v1176_v58, %s1280_s13  ;;  %v1106_v61 = vpop.f32.mrb[21].mxu0  ;;  %v1198_v58 = vld [vmem:[%s1562_s8 + $0x30] sm:$0xff]   ;;  %s1282_s13 = smov [#allocation2]  }
 0x5fc   :  { %v639_v62 = vpop.f32.mrb[22].mxu0 }
 0x5fd   :  { %v1181_v63 = vpack.i.bf16 %v639_v62, %v636_v60  ;;  %v1107_v2 = vpop.f32.mrb[23].mxu0  ;;  %v1003_v60 = vld [vmem:[%s1561_s7] ss:$0 sm:$0xff] }
 0x5ff   :  { %1182 = vrot.lane.b32.xlu1 %v1181_v63, %s1281_s4  ;;  %s976_s4 = sshll.u32 %s1282_s13, 4  ;;  %s977_s4 = int_to_ptr.vmem [resolvable:$true] %s976_s4 }
 0x600   :  { %s1248_s14 = scalar_lea.vmem %s977_s4, 256  ;;  %p1253_p1 = scmp.lt.s32.totalorder %s977_s4, %s977_s4 }
 0x601   :  { %p1249_p0 = scmp.ne.s32.totalorder %s977_s4, %s1248_s14  ;;  %p1254_p2 = scmp.lt.s32.totalorder %s1248_s14, %s1248_s14 }
 0x603   :  { %p1255_p3 = por %p1254_p2, %p1253_p1 }
 0x605   :  { %p1256_p4 = pnand %p1255_p3, %p1249_p0 }
 0x669   :  { %v1173_v3 = vpop.permute.xlu1 %1172 }
 0x66a   :  { %v1175_v5 = vunpack.i.h.bf16 %v1173_v3  ;;  %v1174_v6 = vunpack.i.l.bf16 %v1173_v3 }
 0x66c   :  { %v668_v10 = vsel %vm164_vm2, %v498_v36, %v1175_v5  ;;  %v667_v11 = vsel %vm164_vm2, %v495_v42, %v1174_v6 }
 0x66d   :  { %v1178_v4 = vpop.permute.xlu0 %1177 }
 0x66e   :  { %v1180_v7 = vunpack.i.h.bf16 %v1178_v4  ;;  %v1179_v8 = vunpack.i.l.bf16 %v1178_v4 }
 0x670   :  { %v669_v14 = vsel %vm362_vm3, %v667_v11, %v1179_v8  ;;  %v670_v16 = vsel %vm362_vm3, %v668_v10, %v1180_v7 }
 0x671   :  { %v1183_v9 = vpop.permute.xlu1 %1182 }
 0x672   :  { %v1185_v12 = vunpack.i.h.bf16 %v1183_v9  ;;  %v1184_v13 = vunpack.i.l.bf16 %v1183_v9 }
 0x674   :  { %v673_v17 = vsel %vm671_vm4, %v670_v16, %v1185_v12  ;;  %v672_v18 = vsel %vm671_vm4, %v669_v14, %v1184_v13 }
 0x675   :  { %v674_v19 = vpack.c.bf16 %v673_v17, %v672_v18  ;;  %v1009_v18 = vld [vmem:[%s1563_s9] ss:$0 sm:$0xff] }
 0x677   :  { %1113 = vmatmul.mubr.msk.bf16.vlgmr.msra.gmra.mrb[12].mxu1 %vm39_vm0, %v674_v19 }
 0x678   :  { %1140 = vmatprep.mubr.msk.bf16.mxu1 %vm1273_vm1, %v1272_v15  ;;  %1125 = vmatpush3.bf16.msra.mxu1 %v1192_v52 }
 0x679   :  { %1126 = vmatprep.subr.bf16.mxu1 %v1272_v15 }
 0x67c   :  { %1127 = vmatpush3.bf16.msra.mxu1 %v1193_v53 }
 0x67d   :  { %1128 = vmatprep.subr.bf16.mxu1 %v1272_v15 }
 0x680   :  { %1129 = vmatpush3.bf16.msra.mxu1 %v1194_v54 }
 0x681   :  { %1130 = vmatprep.subr.bf16.mxu1 %v1272_v15 }
 0x684   :  { %1131 = vmatpush3.bf16.msra.mxu1 %v1195_v55 }
 0x685   :  { %1132 = vmatprep.subr.bf16.mxu1 %v1272_v15 }
 0x688   :  { %1133 = vmatpush3.bf16.msra.mxu1 %v1196_v56 }
 0x689   :  { %1134 = vmatprep.subr.bf16.mxu1 %v1272_v15 }
 0x68c   :  { %1135 = vmatpush3.bf16.msra.mxu1 %v1197_v57 }
 0x68d   :  { %1136 = vmatprep.subr.bf16.mxu1 %v1272_v15 }
 0x690   :  { %1137 = vmatpush3.bf16.msra.mxu1 %v1198_v58 }
 0x691   :  { %1138 = vmatprep.subr.bf16.mxu1 %v1272_v15 }
 0x694   :  { %1139 = vmatpush3.bf16.msra.mxu1 %v1199_v59 }
 0x74a   :  { %v735_v48 = vpop.f32.mrb[12].mxu1 }
 0x74b   :  { %v736_v20 = vadd.f32 %v999_v43, %v735_v48  ;;  %v1114_v44 = vpop.f32.mrb[13].mxu1 }
 0x74c   :  { %v738_v21 = vpop.f32.mrb[14].mxu1 }
 0x74d   :  { %v1479_v22 = vadd.f32 %v736_v20, %v1342_v0  ;;  %v739_v23 = vadd.f32 %v999_v43, %v738_v21  ;;  %v1115_v24 = vpop.f32.mrb[15].mxu1 }
 0x74f   :  { %v1482_v25 = vadd.f32 %v739_v23, %v1347_v1  ;;  %v744_v26 = vsel %vm39_vm0, %v1479_v22, 0.0 }
 0x750   :  { %745 = vadd.xlane.f32.xlu0 %v744_v26 }
 0x751   :  { %v747_v27 = vsel %vm39_vm0, %v1482_v25, 0.0 }
 0x752   :  { %748 = vadd.xlane.f32.xlu1 %v747_v27 }
 0x7dd   :  { %v746_v28 = vpop.xlane.xlu0 %745 }
 0x7de   :  { %v750_v29 = vmul.f32 0.03125, %v746_v28 }
 0x7df   :  { %v749_v30 = vpop.xlane.xlu1 %748 }
 0x7e0   :  { %v752_v31 = vsub.f32 %v1479_v22, %v750_v29  ;;  %v751_v0 = vmul.f32 0.03125, %v749_v30 }
 0x7e2   :  { %v753_v32 = vsub.f32 %v1482_v25, %v751_v0  ;;  %v754_v33 = vmul.f32 %v752_v31, %v752_v31 }
 0x7e4   :  { %v756_v1 = vsel %vm39_vm0, %v754_v33, 0.0  ;;  %v755_v34 = vmul.f32 %v753_v32, %v753_v32 }
 0x7e5   :  { %757 = vadd.xlane.f32.xlu0 %v756_v1 }
 0x7e6   :  { %v759_v35 = vsel %vm39_vm0, %v755_v34, 0.0 }
 0x7e9   :  { %760 = vadd.xlane.f32.xlu0 %v759_v35 }
 0x872   :  { %v758_v39 = vpop.xlane.xlu0 %757 }
 0x873   :  { %v762_v40 = vmul.f32 0.03125, %v758_v39 }
 0x875   :  { %v764_v41 = vadd.f32 1e-05, %v762_v40 }
 0x876   :  { %v761_v42 = vpop.xlane.xlu0 %760 }
 0x877   :  { %v763_v45 = vmul.f32 0.03125, %v761_v42  ;;  %1236 = vrsqrt.f32 %v764_v41 }
 0x879   :  { %v765_v36 = vadd.f32 1e-05, %v763_v45 }
 0x87b   :  { %1238 = vrsqrt.f32 %v765_v36 }
 0x881   :  { %v1237_v46 = vpop.eup %1236 }
 0x882   :  { %v768_v49 = vmul.f32 %v1237_v46, %v752_v31 }
 0x885   :  { %v1239_v47 = vpop.eup %1238 }
 0x886   :  { %v769_v50 = vmul.f32 %v1239_v47, %v753_v32 }
 0x888   :  { %v770_v51 = vpack.c.bf16 %v769_v50, %v768_v49 }
 0x88a   :  { %1121 = vmatmul.mubr.msk.bf16.vlgmr.msra.gmra.mrb[24].mxu0 %vm39_vm0, %v770_v51 }
 0x95d   :  { %v831_v61 = vpop.f32.mrb[24].mxu0 }
 0x95e   :  { %v832_v62 = vadd.f32 %v1003_v60, %v831_v61  ;;  %v1122_v63 = vpop.f32.mrb[25].mxu0 }
 0x95f   :  { %v834_v2 = vpop.f32.mrb[26].mxu0 }
 0x960   :  { %v1007_v3 = vmul.f32 -1.702, %v832_v62  ;;  %v835_v4 = vadd.f32 %v1003_v60, %v834_v2  ;;  %v1123_v5 = vpop.f32.mrb[27].mxu0 }
 0x962   :  { %v842_v6 = vmul.f32 1.442695, %v1007_v3  ;;  %v1008_v7 = vmul.f32 -1.702, %v835_v4 }
 0x964   :  { %1240 = vpow2.f32 %v842_v6  ;;  %v844_v15 = vmul.f32 1.442695, %v1008_v7 }
 0x966   :  { %1242 = vpow2.f32 %v844_v15 }
 0x96e   :  { %v1241_v8 = vpop.eup %1240 }
 0x96f   :  { %v846_v9 = vadd.f32 1.0, %v1241_v8 }
 0x970   :  { %v1243_v10 = vpop.eup %1242 }
 0x971   :  { %1244 = vrcp.f32 %v846_v9  ;;  %v847_v11 = vadd.f32 1.0, %v1243_v10 }
 0x973   :  { %1246 = vrcp.f32 %v847_v11 }
 0x97b   :  { %v1245_v12 = vpop.eup %1244 }
 0x97c   :  { %v852_v14 = vmul.f32 %v1245_v12, %v832_v62 }
 0x97d   :  { %v1247_v13 = vpop.eup %1246 }
 0x97e   :  { %v853_v16 = vmul.f32 %v1247_v13, %v835_v4 }
 0x980   :  { %v854_v17 = vpack.c.bf16 %v853_v16, %v852_v14 }
 0x982   :  { %1141 = vmatmul.mubr.bf16.vlgmr.msra.gmra.mrb[16].mxu1 %v854_v17 }
 0xa55   :  { %v960_v19 = vpop.f32.mrb[16].mxu1 }
 0xa56   :  { %v961_v43 = vadd.f32 %v1009_v18, %v960_v19  ;;  %v1142_v48 = vpop.f32.mrb[17].mxu1 }
 0xa57   :  { %v963_v20 = vpop.f32.mrb[18].mxu1 }
 0xa58   :  { %v967_v44 = vadd.f32 %v961_v43, %v1479_v22  ;;  %v964_v21 = vadd.f32 %v1009_v18, %v963_v20  ;;  %v1143_v23 = vpop.f32.mrb[19].mxu1 }
 0xa5a   :  { %969 = vst.msk [vmem:[#allocation2] sm:$0xff] %vm39_vm0, %v967_v44  ;;  %v968_v24 = vadd.f32 %v964_v21, %v1482_v25 }
 0xa5c   :  { %970 = vst.msk [vmem:[#allocation2 + $0x8] sm:$0xff] %vm39_vm0, %v968_v24 }
 0xa5d   :  { %1259 = shalt.err (!%p1256_p4)
}
 0xa5e   :  { %s1260_s5 = scalar_lea.hbm %s1564_s10, 256 }
 0xa5f   :  { %p1261_p5 = scmp.ne.s32.totalorder %s1564_s10, %s1260_s5  ;;  %p1264_p6 = scmp.lt.u32.totalorder %s1260_s5, %s1564_s10 }
 0xa61   :  { %p1266_p7 = pnand %p1264_p6, %p1261_p5 }
 0xa63   :  { %1269 = shalt.err (!%p1266_p7)
}
 0xa64   :  { %s1283_s19 = smov 128  }
 0xa65   :  { %982 = dma.vmem_to_hbm [thread:$0]  %s977_s4, 256, %s1564_s10, [#allocation3], %s1283_s19, %s1283_s19, %s1279_s12  }
 0xa66   :  { %1270 = dma.done.wait [#allocation3], 256  }
 0xa67   :  { %1271 = vsyncadd [#allocation3], 4294967040 }
 0xa68   :  { %986 = vsyncpa [#allocation3], 1 }

</bundles_post_ra>
